<compile_context>
chip_gen: v5e
topology: v5e:2x2
jax: 0.10.0
libtpu: 0.0.40
codegen_flags: <defaults>
</compile_context>

<pallas_src>
import jax
import jax.numpy as jnp
from jax.experimental import pallas as pl
from jax.experimental.pallas import tpu as pltpu


def _prompt_assemble_kernel(prefix_ref, ctx_ref, suffix_ref, out_ref):
    # prefix_ref: (C, 1, D)        -- per-class prefix block
    # ctx_ref:    (n_ctx, D)       -- shared learned context (VMEM-resident across steps)
    # suffix_ref: (C, n_suffix, D) -- per-class suffix block
    # out_ref:    (C, 1 + n_ctx + n_suffix, D)
    c = out_ref.shape[0]
    n_ctx, d = ctx_ref.shape

    # Three direct sub-slice stores: no in-register concat, hence no hidden VMEM
    # scratch copy of the whole (C, seq, D) block.  Last dim is lane-dense (mult.
    # of 128); sublane offsets 1 / 1+n_ctx only add cheap sublane masking.
    out_ref[:, 0:1, :] = prefix_ref[...].astype(out_ref.dtype)
    ctx_b = jnp.broadcast_to(ctx_ref[...][None, :, :], (c, n_ctx, d))
    out_ref[:, 1:1 + n_ctx, :] = ctx_b.astype(out_ref.dtype)
    out_ref[:, 1 + n_ctx:, :] = suffix_ref[...].astype(out_ref.dtype)


def _tensorcores_per_chip():
    """Best-effort TensorCores-per-chip query (v7x: 2, v5e/v6e: 1).

    Falls back to 1 (single-TC behaviour) if the query is unavailable, which is
    always correct and costs at most one idle TC on v7x for this tiny kernel.
    """
    try:
        info = pltpu.get_tpu_info()
        for attr in ("tensorcore_count", "num_tensorcores", "num_cores", "core_count"):
            v = getattr(info, attr, None)
            if isinstance(v, int) and v > 0:
                return v
    except Exception:
        pass
    try:
        v = getattr(jax.devices()[0], "num_cores", None)
        if isinstance(v, int) and v > 0:
            return v
    except Exception:
        pass
    return 1


def _pick_class_block(n_cls, per_class_bytes, vmem_budget_bytes, num_tensorcores=1):
    """Largest class block that fits the VMEM budget (no divisor requirement).

    Single-TC chips: one (or few) big steps.  Multi-TC chips: round the step
    count up to a multiple of the TC count so the parallel grid axis balances.
    """
    c_max = max(1, vmem_budget_bytes // max(1, per_class_bytes))
    cb = max(1, min(n_cls, c_max))
    if num_tensorcores > 1 and n_cls >= num_tensorcores:
        steps = -(-n_cls // cb)                       # cdiv
        rem = steps % num_tensorcores
        if rem:
            steps += num_tensorcores - rem
        cb = max(1, -(-n_cls // steps))               # cdiv
    return cb


def vl_prompt_learner_forward(text_ctx, token_prefix, token_suffix,
                              *, class_block=None,
                              vmem_budget_bytes=16 * 1024 * 1024,
                              vmem_limit_bytes=32 * 1024 * 1024):
    """Pallas implementation of VLPromptLearner.forward().

    text_ctx:     (n_ctx, ctx_dim)
    token_prefix: (n_cls, 1, ctx_dim)
    token_suffix: (n_cls, n_suffix, ctx_dim)
    returns:      (n_cls, 1 + n_ctx + n_suffix, ctx_dim)
    """
    n_ctx, ctx_dim = text_ctx.shape
    n_cls = token_prefix.shape[0]
    n_suffix = token_suffix.shape[1]
    seq_len = 1 + n_ctx + n_suffix
    itemsize = jnp.dtype(token_prefix.dtype).itemsize

    if class_block is None:
        # Per-class bytes per grid step: double-buffered prefix + suffix inputs,
        # double-buffered output block, plus an allowance for the broadcast-ctx
        # intermediate written through the sub-slice store.
        per_class_bytes = (2 * (1 + n_suffix + seq_len) + n_ctx) * ctx_dim * itemsize
        # Resident shared-ctx block (still double-buffered) comes off the budget.
        budget = max(per_class_bytes,
                     vmem_budget_bytes - 2 * n_ctx * ctx_dim * itemsize)
        class_block = _pick_class_block(n_cls, per_class_bytes, budget,
                                        _tensorcores_per_chip())
    class_block = max(1, min(int(class_block), n_cls))
    grid = (pl.cdiv(n_cls, class_block),)   # ragged last block OK: pure copy

    return pl.pallas_call(
        _prompt_assemble_kernel,
        out_shape=jax.ShapeDtypeStruct((n_cls, seq_len, ctx_dim), token_prefix.dtype),
        grid_spec=pltpu.PrefetchScalarGridSpec(
            num_scalar_prefetch=0,
            grid=grid,
            in_specs=[
                # per-step block of class prefixes
                pl.BlockSpec((class_block, 1, ctx_dim), lambda i: (i, 0, 0)),
                # shared context: constant block index -> stays VMEM-resident
                pl.BlockSpec((n_ctx, ctx_dim), lambda i: (0, 0)),
                # per-step block of class suffixes
                pl.BlockSpec((class_block, n_suffix, ctx_dim), lambda i: (i, 0, 0)),
            ],
            out_specs=pl.BlockSpec((class_block, seq_len, ctx_dim),
                                   lambda i: (i, 0, 0)),
        ),
        compiler_params=pltpu.CompilerParams(
            dimension_semantics=("parallel",),
            vmem_limit_bytes=vmem_limit_bytes,
        ),
    )(token_prefix, text_ctx, token_suffix)


if __name__ == "__main__":
    # Small, self-consistent shapes (synthetic params; no checkpoint loading).
    n_cls = 8       # number of classes
    n_ctx = 4       # N_CTX_TEXT
    ctx_dim = 128   # TextEncoder.trans_width
    seq_len = 16    # tokenized prompt length (1 prefix + n_ctx + suffix)
    n_suffix = seq_len - 1 - n_ctx

    key = jax.random.PRNGKey(0)
    k_ctx, k_pre, k_suf = jax.random.split(key, 3)

    # nn.Parameter(ctx_vectors); nn.init.normal_(std=0.02)
    text_ctx = 0.02 * jax.random.normal(k_ctx, (n_ctx, ctx_dim), dtype=jnp.float32)
    # frozen token-embedding buffers (deterministic synthetic init)
    token_prefix = jax.random.normal(k_pre, (n_cls, 1, ctx_dim), dtype=jnp.float32)
    token_suffix = jax.random.normal(k_suf, (n_cls, n_suffix, ctx_dim), dtype=jnp.float32)

    # TODO(synk): CLIP tokenization, ULIP token_embedding and the frozen-text-encoder
    # teacher features (frozen_text_emb) are init-time host work with no Pallas
    # equivalent; only forward()'s prompt assembly is implemented.

    # Reference: forward() semantics in plain JAX.
    ctx_expanded = jnp.broadcast_to(text_ctx[None, :, :], (n_cls, n_ctx, ctx_dim))
    ref = jnp.concatenate([token_prefix, ctx_expanded, token_suffix], axis=1)

    # Default (auto-sized, typically a single step on single-TC chips).
    prompts = jax.block_until_ready(
        vl_prompt_learner_forward(text_ctx, token_prefix, token_suffix))
    assert prompts.shape == (n_cls, seq_len, ctx_dim)
    assert prompts.dtype == jnp.float32
    assert jnp.allclose(prompts, ref), "mismatch vs. reference (auto block)"

    # Ragged-grid path: class_block does not divide n_cls (exercises cdiv + masked
    # last block introduced by this revision).
    prompts_ragged = jax.block_until_ready(
        vl_prompt_learner_forward(text_ctx, token_prefix, token_suffix, class_block=3))
    assert jnp.allclose(prompts_ragged, ref), "mismatch vs. reference (ragged grid)"

    print("KERNEL_OK")
</pallas_src>

<mosaic_0001>
module attributes {stable_mosaic.version = 11 : i64} {
  func.func @_prompt_assemble_kernel(%arg0: i32, %arg1: memref<8x1x128xf32, #tpu.memory_space<vmem>>, %arg2: memref<4x128xf32, #tpu.memory_space<vmem>>, %arg3: memref<8x11x128xf32, #tpu.memory_space<vmem>>, %arg4: memref<8x16x128xf32, #tpu.memory_space<vmem>>) attributes {dimension_semantics = [#tpu.dimension_semantics<parallel>], iteration_bounds = array<i64: 1>, scalar_prefetch = 0 : i64, scratch_operands = 0 : i64, tpu.core_type = #tpu.core_type<tc>, window_params = [{transform_indices = @transform_0, window_bounds = array<i64: 8, 1, 128>}, {pipeline_mode = #tpu.pipeline_mode<synchronous>, transform_indices = @transform_1, window_bounds = array<i64: 4, 128>}, {transform_indices = @transform_2, window_bounds = array<i64: 8, 11, 128>}, {transform_indices = @transform_3, window_bounds = array<i64: 8, 16, 128>}]} {
    %c0 = arith.constant 0 : index
    %c0_0 = arith.constant 0 : index
    %c0_1 = arith.constant 0 : index
    %0 = vector.load %arg1[%c0, %c0_0, %c0_1] : memref<8x1x128xf32, #tpu.memory_space<vmem>>, vector<8x1x128xf32>
    %c0_2 = arith.constant 0 : index
    %c0_3 = arith.constant 0 : index
    %c0_4 = arith.constant 0 : index
    %1 = vector.load %arg4[%c0_2, %c0_3, %c0_4] : memref<8x16x128xf32, #tpu.memory_space<vmem>>, vector<8x1x128xf32>
    tpu.vector_store %arg4[%c0_2, %c0_3, %c0_4], %0 {strides = array<i32>} : memref<8x16x128xf32, #tpu.memory_space<vmem>>, vector<8x1x128xf32>,
    %c0_5 = arith.constant 0 : index
    %c0_6 = arith.constant 0 : index
    %2 = vector.load %arg2[%c0_5, %c0_6] : memref<4x128xf32, #tpu.memory_space<vmem>>, vector<4x128xf32>
    %3 = vector.shape_cast %2 : vector<4x128xf32> to vector<1x4x128xf32>
    %4 = vector.shape_cast %3 : vector<1x4x128xf32> to vector<1x4x128xf32>
    %5 = vector.broadcast %4 : vector<1x4x128xf32> to vector<8x4x128xf32>
    %c0_7 = arith.constant 0 : index
    %c1 = arith.constant 1 : index
    %c0_8 = arith.constant 0 : index
    %6 = vector.load %arg4[%c0_7, %c1, %c0_8] : memref<8x16x128xf32, #tpu.memory_space<vmem>>, vector<8x4x128xf32>
    tpu.vector_store %arg4[%c0_7, %c1, %c0_8], %5 {strides = array<i32>} : memref<8x16x128xf32, #tpu.memory_space<vmem>>, vector<8x4x128xf32>,
    %c0_9 = arith.constant 0 : index
    %c0_10 = arith.constant 0 : index
    %c0_11 = arith.constant 0 : index
    %7 = vector.load %arg3[%c0_9, %c0_10, %c0_11] : memref<8x11x128xf32, #tpu.memory_space<vmem>>, vector<8x11x128xf32>
    %c0_12 = arith.constant 0 : index
    %c5 = arith.constant 5 : index
    %c0_13 = arith.constant 0 : index
    %8 = vector.load %arg4[%c0_12, %c5, %c0_13] : memref<8x16x128xf32, #tpu.memory_space<vmem>>, vector<8x11x128xf32>
    tpu.vector_store %arg4[%c0_12, %c5, %c0_13], %7 {strides = array<i32>} : memref<8x16x128xf32, #tpu.memory_space<vmem>>, vector<8x11x128xf32>,
    return
  }
  func.func @transform_0(%arg0: i32) -> (i32, i32, i32) {
    %c0_i32 = arith.constant 0 : i32
    %c0_i32_0 = arith.constant 0 : i32
    %c0_i32_1 = arith.constant 0 : i32
    return %arg0, %c0_i32, %c0_i32_0 : i32, i32, i32
  }
  func.func @transform_1(%arg0: i32) -> (i32, i32) {
    %c0_i32 = arith.constant 0 : i32
    %c0_i32_0 = arith.constant 0 : i32
    %c0_i32_1 = arith.constant 0 : i32
    return %c0_i32, %c0_i32_0 : i32, i32
  }
  func.func @transform_2(%arg0: i32) -> (i32, i32, i32) {
    %c0_i32 = arith.constant 0 : i32
    %c0_i32_0 = arith.constant 0 : i32
    %c0_i32_1 = arith.constant 0 : i32
    return %arg0, %c0_i32, %c0_i32_0 : i32, i32, i32
  }
  func.func @transform_3(%arg0: i32) -> (i32, i32, i32) {
    %c0_i32 = arith.constant 0 : i32
    %c0_i32_0 = arith.constant 0 : i32
    %c0_i32_1 = arith.constant 0 : i32
    return %arg0, %c0_i32, %c0_i32_0 : i32, i32, i32
  }
}

</mosaic_0001>

<bundles_post_ra>
// kernel: tpu_custom_call.1
= control target key start
LH: loop header
LB: loop body
LE: loop exit
PB: predicated region body
PF: predicated region fallthrough
CT: control target
= control target key end

     0   :  { %s220_s0 = inlined_call_operand.vmem [shape: f32[8,1,128], index: 0, kind: input, shape index: {}]   ;;  %s221_s1 = inlined_call_operand.vmem [shape: f32[4,128], index: 1, kind: input, shape index: {}]   ;;  %s222_s2 = inlined_call_operand.vmem [shape: f32[8,11,128], index: 2, kind: input, shape index: {}]   ;;  %s223_s3 = inlined_call_operand.hbm [shape: f32[8,16,128], index: 3, kind: output, shape index: {}]  }
   0x1   :  { %v15_v0 = vld [vmem:[%s220_s0] sm:$0x1]  ;;  %v16_v1 = vld [vmem:[%s220_s0 + $0x1] sm:$0x1]  ;;  %v17_v2 = vld [vmem:[%s220_s0 + $0x2] sm:$0x1] }
   0x2   :  { %23 = vst [vmem:[#allocation2] sm:$0x1] %v15_v0  ;;  %v18_v3 = vld [vmem:[%s220_s0 + $0x3] sm:$0x1]  ;;  %v19_v4 = vld [vmem:[%s220_s0 + $0x4] sm:$0x1] }
   0x3   :  { %24 = vst [vmem:[#allocation2 + $0x10] sm:$0x1] %v16_v1  ;;  %v20_v5 = vld [vmem:[%s220_s0 + $0x5] sm:$0x1]  ;;  %v21_v6 = vld [vmem:[%s220_s0 + $0x6] sm:$0x1] }
   0x4   :  { %25 = vst [vmem:[#allocation2 + $0x20] sm:$0x1] %v17_v2  ;;  %v22_v7 = vld [vmem:[%s220_s0 + $0x7] sm:$0x1]  ;;  %v31_v8 = vld [vmem:[%s221_s1] sm:$0xf] }
   0x5   :  { %26 = vst [vmem:[#allocation2 + $0x30] sm:$0x1] %v18_v3 }
   0x6   :  { %27 = vst [vmem:[#allocation2 + $0x40] sm:$0x1] %v19_v4 }
   0x7   :  { %28 = vst [vmem:[#allocation2 + $0x50] sm:$0x1] %v20_v5 }
   0x8   :  { %29 = vst [vmem:[#allocation2 + $0x60] sm:$0x1] %v21_v6 }
   0x9   :  { %30 = vst [vmem:[#allocation2 + $0x70] sm:$0x1] %v22_v7 }
   0xa   :  { %32 = vst [vmem:[#allocation2 + $0x1] sm:$0xf] %v31_v8 }
   0xb   :  { %33 = vst [vmem:[#allocation2 + $0x11] sm:$0xf] %v31_v8 }
   0xc   :  { %8 = vsyncpa [#allocation3], 0  ;;  %34 = vst [vmem:[#allocation2 + $0x21] sm:$0xf] %v31_v8  ;;  %v40_v9 = vld [vmem:[%s222_s2] sm:$0xff]  ;;  %v42_v11 = vld [vmem:[%s222_s2 + $0x10] sm:$0xff] }
   0xd   :  { %35 = vst [vmem:[#allocation2 + $0x31] sm:$0xf] %v31_v8  ;;  %v41_v10 = vld [vmem:[%s222_s2 + $0x8] sm:$0x7]  ;;  %v43_v12 = vld [vmem:[%s222_s2 + $0x18] sm:$0x7] }
   0xe   :  { %36 = vst [vmem:[#allocation2 + $0x41] sm:$0xf] %v31_v8  ;;  %v44_v13 = vld [vmem:[%s222_s2 + $0x20] sm:$0xff]  ;;  %v45_v14 = vld [vmem:[%s222_s2 + $0x28] sm:$0x7]  ;;  %v46_v15 = vld [vmem:[%s222_s2 + $0x30] sm:$0xff] }
   0xf   :  { %37 = vst [vmem:[#allocation2 + $0x51] sm:$0xf] %v31_v8  ;;  %v47_v16 = vld [vmem:[%s222_s2 + $0x38] sm:$0x7]  ;;  %v48_v17 = vld [vmem:[%s222_s2 + $0x40] sm:$0xff]  ;;  %v50_v19 = vld [vmem:[%s222_s2 + $0x50] sm:$0xff] }
  0x10   :  { %38 = vst [vmem:[#allocation2 + $0x61] sm:$0xf] %v31_v8  ;;  %v49_v18 = vld [vmem:[%s222_s2 + $0x48] sm:$0x7]  ;;  %v51_v20 = vld [vmem:[%s222_s2 + $0x58] sm:$0x7] }
  0x11   :  { %39 = vst [vmem:[#allocation2 + $0x71] sm:$0xf] %v31_v8  ;;  %v52_v21 = vld [vmem:[%s222_s2 + $0x60] sm:$0xff]  ;;  %s119_s27 = smov [#allocation2]   ;;  %s78_s4 = sshll.u32 %s223_s3, 4  ;;  %v54_v23 = vld [vmem:[%s222_s2 + $0x70] sm:$0xff]  ;;  %s79_s4 = int_to_ptr.hbm [resolvable:$true] %s78_s4 }
  0x12   :  { %56 = vst [vmem:[#allocation2 + $0x5] sm:$0xff] %v40_v9  ;;  %s76_s28 = sshll.u32 %s119_s27, 4  ;;  %v53_v22 = vld [vmem:[%s222_s2 + $0x68] sm:$0x7]  ;;  %v55_v24 = vld [vmem:[%s222_s2 + $0x78] sm:$0x7]  ;;  %s77_s28 = int_to_ptr.vmem [resolvable:$true] %s76_s28 }
  0x13   :  { %57 = vst [vmem:[#allocation2 + $0xd] sm:$0x7] %v41_v10  ;;  %s120_s3 = smov 128   ;;  %s121_s9 = smov 8  }
  0x14   :  { %58 = vst [vmem:[#allocation2 + $0x15] sm:$0xff] %v42_v11 }
  0x15   :  { %59 = vst [vmem:[#allocation2 + $0x1d] sm:$0x7] %v43_v12 }
  0x16   :  { %60 = vst [vmem:[#allocation2 + $0x25] sm:$0xff] %v44_v13 }
  0x17   :  { %61 = vst [vmem:[#allocation2 + $0x2d] sm:$0x7] %v45_v14 }
  0x18   :  { %62 = vst [vmem:[#allocation2 + $0x35] sm:$0xff] %v46_v15 }
  0x19   :  { %63 = vst [vmem:[#allocation2 + $0x3d] sm:$0x7] %v47_v16 }
  0x1a   :  { %64 = vst [vmem:[#allocation2 + $0x45] sm:$0xff] %v48_v17 }
  0x1b   :  { %65 = vst [vmem:[#allocation2 + $0x4d] sm:$0x7] %v49_v18 }
  0x1c   :  { %66 = vst [vmem:[#allocation2 + $0x55] sm:$0xff] %v50_v19 }
  0x1d   :  { %67 = vst [vmem:[#allocation2 + $0x5d] sm:$0x7] %v51_v20 }
  0x1e   :  { %68 = vst [vmem:[#allocation2 + $0x65] sm:$0xff] %v52_v21 }
  0x1f   :  { %69 = vst [vmem:[#allocation2 + $0x6d] sm:$0x7] %v53_v22 }
  0x20   :  { %70 = vst [vmem:[#allocation2 + $0x75] sm:$0xff] %v54_v23 }
  0x21   :  { %71 = vst [vmem:[#allocation2 + $0x7d] sm:$0x7] %v55_v24 }
  0x22   :  { %84 = dma.vmem_to_hbm [thread:$0]  %s77_s28, 2048, %s79_s4, [#allocation3], %s120_s3, %s120_s3, %s121_s9  }
  0x23   :  { %117 = dma.done.wait [#allocation3], 2048  }
  0x24   :  { %118 = vsyncadd [#allocation3], 4294965248 }
  0x25   :  { %89 = vsyncpa [#allocation3], 1 }

</bundles_post_ra>
